<compile_context>
chip_gen: v6e
topology: v6e:2x2x1
jax: 0.10.0
libtpu: 0.0.40
codegen_flags: <defaults>
</compile_context>

<pallas_src>
import jax
import jax.numpy as jnp
from jax.experimental import pallas as pl
from jax.experimental.pallas import tpu as pltpu

TABLE_ROWS = 100
TABLE_COLS = 9
_PAD_ROWS = 128   # one-hot width: one 128x128 MXU pass (v5e), sub-tile on v6e/v7x
_PAD_COLS = 128   # lane-dense output / table slab


def _gather_kernel(idx_ref, table_ref, out_ref):
    # idx_ref:   (blk, 1)   int32 VMEM
    # table_ref: (128, 128) f32   VMEM (padded table, resident across grid)
    # out_ref:   (blk, 128) f32   VMEM (lane-dense, unmasked stores)
    idx = idx_ref[...]                                   # (blk, 1)
    # torch/jax semantics: negative indices wrap to the end of the table.
    idx = jnp.where(idx < 0, idx + TABLE_ROWS, idx)
    # Clamp matches jnp's behaviour for out-of-range (torch would raise).
    idx = jnp.clip(idx, 0, TABLE_ROWS - 1)

    row_ids = jax.lax.broadcasted_iota(jnp.int32, (idx.shape[0], _PAD_ROWS), 1)
    one_hot = (row_ids == idx).astype(table_ref.dtype)   # exact 0/1 f32, (blk, 128)

    # Single MXU pass replaces the per-index copy loop; 0/1 weights +
    # HIGHEST precision + f32 accumulation keep the row copy exact.
    out_ref[...] = jnp.dot(
        one_hot,
        table_ref[...],
        preferred_element_type=jnp.float32,
        precision=jax.lax.Precision.HIGHEST,
    ).astype(out_ref.dtype)


def gather_rows(table, index, *, block_rows=512):
    """table: (R, C) f32 with R<=128, C<=128.  index: int array, any shape.
    Returns index.shape + (C,) with torch/jax row-gather semantics."""
    rows, cols = table.shape
    assert rows <= _PAD_ROWS and cols <= _PAD_COLS

    idx_flat = index.reshape(-1).astype(jnp.int32)
    n = idx_flat.shape[0]

    # Pad the index axis to sublane multiple and pick a per-step block.
    n8 = max(8, -(-n // 8) * 8)
    blk = min(block_rows, n8)
    n_pad = -(-n8 // blk) * blk
    idx_pad = jnp.zeros((n_pad, 1), jnp.int32).at[:n, 0].set(idx_flat)

    # Pad the constant table once to a lane/MXU-friendly slab (done host-side;
    # the table is a module constant so this is a one-time cost).
    table_pad = jnp.zeros((_PAD_ROWS, _PAD_COLS), table.dtype)
    table_pad = table_pad.at[:rows, :cols].set(table)

    grid = (n_pad // blk,)
    out_pad = pl.pallas_call(
        _gather_kernel,
        out_shape=jax.ShapeDtypeStruct((n_pad, _PAD_COLS), table.dtype),
        grid=grid,
        in_specs=[
            # Indices: one (blk, 1) vector block per grid step.
            pl.BlockSpec((blk, 1), lambda i: (i, 0)),
            # Table: constant block index -> stays resident in VMEM.
            pl.BlockSpec((_PAD_ROWS, _PAD_COLS), lambda i: (0, 0)),
        ],
        out_specs=pl.BlockSpec((blk, _PAD_COLS), lambda i: (i, 0)),
        compiler_params=pltpu.CompilerParams(
            dimension_semantics=("parallel",),  # shards across v7x's 2 TCs
        ),
    )(idx_pad, table_pad)

    return out_pad[:n, :cols].reshape(index.shape + (cols,))


if __name__ == "__main__":
    key = jax.random.PRNGKey(0)
    k_table, k_idx = jax.random.split(key)

    # Deterministic stand-in for torch.randn(100, 9) in __init__.
    table = jax.random.normal(k_table, (TABLE_ROWS, TABLE_COLS), dtype=jnp.float32)
    # Index input of shape (1, 2), values in [0, 100)  (Gather_F32_R2_C1_2).
    index = jax.random.randint(k_idx, (1, 2), 0, TABLE_ROWS, dtype=jnp.int32)

    out = gather_rows(table, index)
    out = jax.block_until_ready(out)

    # Reference: plain JAX advanced indexing (same semantics as torch).
    ref = table[index]
    assert out.shape == (1, 2, TABLE_COLS), out.shape
    assert out.dtype == jnp.float32
    assert jnp.allclose(out, ref), "mismatch vs reference gather"

    print("KERNEL_OK")
</pallas_src>

<mosaic_0001>
module attributes {stable_mosaic.version = 11 : i64} {
  func.func @_gather_kernel(%arg0: i32, %arg1: memref<8x1xi32, #tpu.memory_space<vmem>>, %arg2: memref<128x128xf32, #tpu.memory_space<vmem>>, %arg3: memref<8x128xf32, #tpu.memory_space<vmem>>) attributes {dimension_semantics = [#tpu.dimension_semantics<parallel>], iteration_bounds = array<i64: 1>, scalar_prefetch = 0 : i64, scratch_operands = 0 : i64, tpu.core_type = #tpu.core_type<tc>, window_params = [{transform_indices = @transform_0, window_bounds = array<i64: 8, 1>}, {pipeline_mode = #tpu.pipeline_mode<synchronous>, transform_indices = @transform_1, window_bounds = array<i64: 128, 128>}, {transform_indices = @transform_2, window_bounds = array<i64: 8, 128>}]} {
    %c0 = arith.constant 0 : index
    %c0_0 = arith.constant 0 : index
    %0 = vector.load %arg1[%c0, %c0_0] : memref<8x1xi32, #tpu.memory_space<vmem>>, vector<8x1xi32>
    %c0_i32 = arith.constant 0 : i32
    %1 = vector.broadcast %c0_i32 : i32 to vector<8x1xi32>
    %2 = arith.cmpi slt, %0, %1 : vector<8x1xi32>
    %c100_i32 = arith.constant 100 : i32
    %3 = vector.broadcast %c100_i32 : i32 to vector<8x1xi32>
    %4 = arith.addi %0, %3 : vector<8x1xi32>
    %5 = arith.select %2, %4, %0 : vector<8x1xi1>, vector<8x1xi32>
    %c0_i32_1 = arith.constant 0 : i32
    %c99_i32 = arith.constant 99 : i32
    %6 = vector.broadcast %c0_i32_1 : i32 to vector<8x1xi32>
    %7 = arith.maxsi %6, %5 : vector<8x1xi32>
    %8 = vector.broadcast %c99_i32 : i32 to vector<8x1xi32>
    %9 = arith.minsi %8, %7 : vector<8x1xi32>
    %10 = tpu.iota {dimensions = array<i32: 1>} : vector<8x128xi32>
    %11 = vector.broadcast %9 : vector<8x1xi32> to vector<8x128xi32>
    %12 = arith.cmpi eq, %10, %11 : vector<8x128xi32>
    %13 = arith.extui %12 : vector<8x128xi1> to vector<8x128xi32>
    %14 = arith.sitofp %13 : vector<8x128xi32> to vector<8x128xf32>
    %c0_2 = arith.constant 0 : index
    %c0_3 = arith.constant 0 : index
    %15 = vector.load %arg2[%c0_2, %c0_3] : memref<128x128xf32, #tpu.memory_space<vmem>>, vector<128x128xf32>
    %cst = arith.constant dense<0.000000e+00> : vector<8x128xf32>
    %16 = tpu.matmul %14, %15, %cst {dimension_numbers = #tpu.dot_dimension_numbers<[1], [0], [0], [1], [0, 0, 1, 1], [], []>, precision = #tpu.contract_precision<fp32>} : vector<8x128xf32>, vector<128x128xf32>, vector<8x128xf32> -> vector<8x128xf32>
    %c0_4 = arith.constant 0 : index
    %c0_5 = arith.constant 0 : index
    %17 = vector.load %arg3[%c0_4, %c0_5] : memref<8x128xf32, #tpu.memory_space<vmem>>, vector<8x128xf32>
    tpu.vector_store %arg3[%c0_4, %c0_5], %16 {strides = array<i32>} : memref<8x128xf32, #tpu.memory_space<vmem>>, vector<8x128xf32>,
    return
  }
  func.func @transform_0(%arg0: i32) -> (i32, i32) {
    %c0_i32 = arith.constant 0 : i32
    %c0_i32_0 = arith.constant 0 : i32
    return %arg0, %c0_i32 : i32, i32
  }
  func.func @transform_1(%arg0: i32) -> (i32, i32) {
    %c0_i32 = arith.constant 0 : i32
    %c0_i32_0 = arith.constant 0 : i32
    %c0_i32_1 = arith.constant 0 : i32
    return %c0_i32, %c0_i32_0 : i32, i32
  }
  func.func @transform_2(%arg0: i32) -> (i32, i32) {
    %c0_i32 = arith.constant 0 : i32
    %c0_i32_0 = arith.constant 0 : i32
    return %arg0, %c0_i32 : i32, i32
  }
}

</mosaic_0001>

<bundles_post_ra>
// kernel: tpu_custom_call.1
= control target key start
LH: loop header
LB: loop body
LE: loop exit
PB: predicated region body
PF: predicated region fallthrough
CT: control target
= control target key end

     0   :  { %7 = vsyncpa [#allocation3], 0  ;;  %s1491_s0 = inlined_call_operand.vmem [shape: s32[8,1], index: 0, kind: input, shape index: {}]   ;;  %s1492_s1 = inlined_call_operand.hbm [shape: f32[128,128], index: 1, kind: input, shape index: {}]   ;;  %s1493_s2 = inlined_call_operand.hbm [shape: f32[8,128], index: 2, kind: output, shape index: {}]  }
   0x1   :  { %8 = vsyncpa [#allocation4], 0  ;;  %s1084_s9 = smov [#allocation2]  }
   0x2   :  { %s16_s10 = sshll.u32 %s1084_s9, 4  ;;  %s17_s10 = int_to_ptr.vmem [resolvable:$true] %s16_s10 }
   0x3   :  { %s1048_s11 = scalar_lea.vmem %s17_s10, 2048  ;;  %p1053_p1 = scmp.lt.s32.totalorder %s17_s10, %s17_s10 }
   0x4   :  { %p1049_p0 = scmp.ne.s32.totalorder %s17_s10, %s1048_s11  ;;  %p1054_p2 = scmp.lt.s32.totalorder %s1048_s11, %s1048_s11 }
   0x6   :  { %p1055_p3 = por %p1054_p2, %p1053_p1 }
   0x8   :  { %p1056_p4 = pnand %p1055_p3, %p1049_p0 }
   0xa   :  { %1059 = shalt.err (!%p1056_p4)
}
   0xb   :  { %s1085_s12 = smov 128   ;;  %s1086_s13 = smov 8  }
   0xc   :  { %22 = dma.hbm_to_vmem [thread:$0]  %s1492_s1, 2048, %s17_s10, [#allocation3], %s1085_s12, %s1085_s12, %s1086_s13  }
   0xd   :  { %1080 = dma.done.wait [#allocation3], 2048  }
   0xe   :  { %1081 = vsyncadd [#allocation3], 4294965248  ;;  %v1087_v0 = vmov 0   ;;  %v1088_v1 = vmov 0.0   ;;  %v26_v2 = vld [vmem:[%s1491_s0] sm:$0xff]  ;;  %v57_v3 = vld [vmem:[#allocation2 + $0x78] sm:$0xff] }
   0xf   :  { %1039 = vset.pattern.permute.xlu0 %v1087_v0  ;;  %856 = vmatprep.subr.mxu1 %v1088_v1  ;;  %v56_v4 = vld [vmem:[#allocation2 + $0x70] sm:$0xff]  ;;  %vm27_vm0 = vcmp.lt.s32.totalorder %v26_v2, 0  ;;  %v28_v5 = vadd.s32 100, %v26_v2  ;;  %v1115_v6 = vand.u32 4294901760, %v57_v3  ;;  %v55_v8 = vld [vmem:[#allocation2 + $0x68] sm:$0xff]  ;;  %v54_v9 = vld [vmem:[#allocation2 + $0x60] sm:$0xff] }
  0x10   :  { %821 = vmatprep.subr.mxu0 %v1088_v1  ;;  %v1117_v7 = vand.u32 4294901760, %v56_v4  ;;  %v1119_v10 = vand.u32 4294901760, %v55_v8  ;;  %v1121_v11 = vand.u32 4294901760, %v54_v9  ;;  %v53_v12 = vld [vmem:[#allocation2 + $0x58] sm:$0xff]  ;;  %v52_v13 = vld [vmem:[#allocation2 + $0x50] sm:$0xff]  ;;  %v51_v25 = vld [vmem:[#allocation2 + $0x48] sm:$0xff] }
  0x11   :  { %v29_v14 = vsel %vm27_vm0, %v28_v5, %v26_v2  ;;  %v1124_v15 = vsub.f32 %v57_v3, %v1115_v6  ;;  %v1129_v17 = vand.u32 4294901760, %v53_v12  ;;  %822 = vmatpush3.msra.mxu0 %v1115_v6  ;;  %v1139_v20 = vand.u32 4294901760, %v52_v13  ;;  %v50_v29 = vld [vmem:[#allocation2 + $0x40] sm:$0xff]  ;;  %v49_v37 = vld [vmem:[#allocation2 + $0x38] sm:$0xff]  ;;  %v48_v38 = vld [vmem:[#allocation2 + $0x30] sm:$0xff]  ;;  %s1091_s0 = smov [#allocation5]  }
  0x12   :  { %v1127_v16 = vsub.f32 %v56_v4, %v1117_v7  ;;  %vm30_vm1 = vcmp.gt.s32.totalorder %v29_v14, 0  ;;  %v1133_v18 = vsub.f32 %v55_v8, %v1119_v10  ;;  %v1136_v19 = vsub.f32 %v54_v9, %v1121_v11  ;;  %823 = vmatprep.subr.mxu0 %v1088_v1  ;;  %v47_v43 = vld [vmem:[#allocation2 + $0x28] sm:$0xff]  ;;  %v46_v44 = vld [vmem:[#allocation2 + $0x20] sm:$0xff]  ;;  %v45_v51 = vld [vmem:[#allocation2 + $0x18] sm:$0xff]  ;;  %s706_s1 = sshll.u32 %s1091_s0, 4  ;;  %s707_s1 = int_to_ptr.vmem [resolvable:$true] %s706_s1 }
  0x13   :  { %v31_v21 = vsel %vm30_vm1, %v29_v14, 0  ;;  %v152_v22 = vand.u32 4294901760, %v1124_v15  ;;  %v1144_v24 = vsub.f32 %v53_v12, %v1129_v17  ;;  %824 = vmatpush3.msra.mxu0 %v1117_v7  ;;  %v1150_v28 = vsub.f32 %v52_v13, %v1139_v20  ;;  %v44_v61 = vld [vmem:[#allocation2 + $0x10] sm:$0xff]  ;;  %v43_v4 = vld [vmem:[#allocation2 + $0x8] sm:$0xff]  ;;  %v42_v14 = vld [vmem:[#allocation2] sm:$0xff]  ;;  %s1060_s18 = scalar_lea.vmem %s707_s1, 128  ;;  %p1065_p6 = scmp.lt.s32.totalorder %s707_s1, %s707_s1 }
  0x14   :  { %v159_v23 = vand.u32 4294901760, %v1127_v16  ;;  %vm32_vm2 = vcmp.lt.s32.totalorder %v31_v21, 99  ;;  %v166_v26 = vand.u32 4294901760, %v1133_v18  ;;  %v173_v27 = vand.u32 4294901760, %v1136_v19  ;;  %825 = vmatprep.subr.mxu0 %v1088_v1  ;;  %p1061_p5 = scmp.ne.s32.totalorder %s707_s1, %s1060_s18  ;;  %p1066_p7 = scmp.lt.s32.totalorder %s1060_s18, %s1060_s18 }
  0x15   :  { %v33_v30 = vsel %vm32_vm2, %v31_v21, 99  ;;  %v153_v31 = vsub.f32 %v1124_v15, %v152_v22  ;;  %v180_v33 = vand.u32 4294901760, %v1144_v24  ;;  %826 = vmatpush3.msra.mxu0 %v1119_v10  ;;  %v1167_v36 = vand.u32 4294901760, %v51_v25 }
  0x16   :  { %v160_v32 = vsub.f32 %v1127_v16, %v159_v23  ;;  %37 = vperm.xlu0 %1039, %v33_v30   ;;  %v167_v34 = vsub.f32 %v1133_v18, %v166_v26  ;;  %v174_v35 = vsub.f32 %v1136_v19, %v173_v27  ;;  %827 = vmatprep.subr.mxu0 %v1088_v1  ;;  %v187_v41 = vand.u32 4294901760, %v1150_v28  ;;  %p1067_p8 = por %p1066_p7, %p1065_p6 }
  0x17   :  { %v154_v39 = vand.u32 4294901760, %v153_v31  ;;  %v1171_v42 = vand.u32 4294901760, %v50_v29  ;;  %828 = vmatpush3.msra.mxu0 %v1121_v11  ;;  %v181_v45 = vsub.f32 %v1144_v24, %v180_v33  ;;  %v1178_v46 = vsub.f32 %v51_v25, %v1167_v36 }
  0x18   :  { %v161_v40 = vand.u32 4294901760, %v160_v32  ;;  %829 = vmatprep.subr.mxu0 %v1088_v1  ;;  %v168_v47 = vand.u32 4294901760, %v167_v34  ;;  %v1184_v49 = vand.u32 4294901760, %v49_v37  ;;  %v1187_v50 = vand.u32 4294901760, %v48_v38  ;;  %p1068_p9 = pnand %p1067_p8, %p1061_p5 }
  0x19   :  { %857 = vmatpush3.msra.mxu1 %v154_v39  ;;  %v1182_v48 = vsub.f32 %v50_v29, %v1171_v42  ;;  %830 = vmatpush3.msra.mxu0 %v1129_v17  ;;  %v175_v52 = vand.u32 4294901760, %v174_v35  ;;  %v194_v53 = vand.u32 4294901760, %v1178_v46  ;;  %v1192_v54 = vand.u32 4294901760, %v47_v43 }
  0x1a   :  { %858 = vmatprep.subr.mxu1 %v1088_v1  ;;  %831 = vmatprep.subr.mxu0 %v1088_v1  ;;  %v1194_v55 = vand.u32 4294901760, %v46_v44  ;;  %v188_v56 = vsub.f32 %v1150_v28, %v187_v41  ;;  %v1201_v58 = vsub.f32 %v49_v37, %v1184_v49  ;;  %v1204_v59 = vsub.f32 %v48_v38, %v1187_v50 }
  0x1b   :  { %859 = vmatpush3.msra.mxu1 %v161_v40  ;;  %v201_v57 = vand.u32 4294901760, %v1182_v48  ;;  %832 = vmatpush3.msra.mxu0 %v1139_v20  ;;  %v1209_v60 = vand.u32 4294901760, %v45_v51  ;;  %v182_v62 = vand.u32 4294901760, %v181_v45  ;;  %v195_v63 = vsub.f32 %v1178_v46, %v194_v53 }
  0x1c   :  { %860 = vmatprep.subr.mxu1 %v1088_v1  ;;  %833 = vmatprep.subr.mxu0 %v1088_v1  ;;  %v208_v0 = vand.u32 4294901760, %v1201_v58  ;;  %v1216_v2 = vsub.f32 %v47_v43, %v1192_v54  ;;  %v1222_v3 = vsub.f32 %v46_v44, %v1194_v55  ;;  %v189_v5 = vand.u32 4294901760, %v188_v56 }
  0x1d   :  { %861 = vmatpush3.msra.mxu1 %v168_v47  ;;  %834 = vmatpush3.msra.mxu0 %v1167_v36  ;;  %v202_v8 = vsub.f32 %v1182_v48, %v201_v57  ;;  %v215_v9 = vand.u32 4294901760, %v1204_v59  ;;  %v1229_v12 = vand.u32 4294901760, %v44_v61  ;;  %v1234_v13 = vsub.f32 %v45_v51, %v1209_v60 }
  0x1e   :  { %862 = vmatprep.subr.mxu1 %v1088_v1  ;;  %835 = vmatprep.subr.mxu0 %v1088_v1  ;;  %v196_v21 = vand.u32 4294901760, %v195_v63  ;;  %v209_v25 = vsub.f32 %v1201_v58, %v208_v0  ;;  %v222_v29 = vand.u32 4294901760, %v1216_v2  ;;  %v1241_v30 = vand.u32 4294901760, %v43_v4 }
  0x1f   :  { %863 = vmatpush3.msra.mxu1 %v175_v52  ;;  %836 = vmatpush3.msra.mxu0 %v1171_v42  ;;  %v229_v31 = vand.u32 4294901760, %v1222_v3  ;;  %v203_v32 = vand.u32 4294901760, %v202_v8  ;;  %v216_v34 = vsub.f32 %v1204_v59, %v215_v9  ;;  %v1250_v35 = vsub.f32 %v44_v61, %v1229_v12 }
  0x20   :  { %864 = vmatprep.subr.mxu1 %v1088_v1  ;;  %837 = vmatprep.subr.mxu0 %v1088_v1  ;;  %v1253_v37 = vand.u32 4294901760, %v42_v14  ;;  %v236_v38 = vand.u32 4294901760, %v1234_v13  ;;  %v210_v39 = vand.u32 4294901760, %v209_v25  ;;  %v223_v40 = vsub.f32 %v1216_v2, %v222_v29 }
  0x21   :  { %865 = vmatpush3.msra.mxu1 %v182_v62  ;;  %838 = vmatpush3.msra.mxu0 %v1184_v49  ;;  %v1262_v43 = vsub.f32 %v43_v4, %v1241_v30  ;;  %v217_v44 = vand.u32 4294901760, %v216_v34  ;;  %v230_v45 = vsub.f32 %v1222_v3, %v229_v31  ;;  %v243_v47 = vand.u32 4294901760, %v1250_v35 }
  0x22   :  { %866 = vmatprep.subr.mxu1 %v1088_v1  ;;  %839 = vmatprep.subr.mxu0 %v1088_v1  ;;  %v1272_v51 = vsub.f32 %v42_v14, %v1253_v37  ;;  %vm1089_vm3 = vmmov 0   ;;  %v224_v52 = vand.u32 4294901760, %v223_v40  ;;  %v237_v56 = vsub.f32 %v1234_v13, %v236_v38 }
  0x23   :  { %867 = vmatpush3.msra.mxu1 %v189_v5  ;;  %840 = vmatpush3.msra.mxu0 %v1187_v50  ;;  %v250_v61 = vand.u32 4294901760, %v1262_v43  ;;  %v231_v62 = vand.u32 4294901760, %v230_v45  ;;  %v244_v63 = vsub.f32 %v1250_v35, %v243_v47  ;;  %v34_v34 = vlaneseq }
  0x24   :  { %868 = vmatprep.subr.mxu1 %v1088_v1  ;;  %841 = vmatprep.subr.mxu0 %v1088_v1  ;;  %v257_v4 = vand.u32 4294901760, %v1272_v51  ;;  %v238_v5 = vand.u32 4294901760, %v237_v56  ;;  %v1090_v45 = vmov 1.0  }
  0x25   :  { %869 = vmatpush3.msra.mxu1 %v196_v21  ;;  %842 = vmatpush3.msra.mxu0 %v1192_v54  ;;  %v251_v8 = vsub.f32 %v1262_v43, %v250_v61  ;;  %v245_v14 = vand.u32 4294901760, %v244_v63 }
  0x26   :  { %870 = vmatprep.subr.mxu1 %v1088_v1  ;;  %843 = vmatprep.subr.mxu0 %v1088_v1  ;;  %v258_v21 = vsub.f32 %v1272_v51, %v257_v4 }
  0x27   :  { %871 = vmatpush3.msra.mxu1 %v203_v32  ;;  %844 = vmatpush3.msra.mxu0 %v1194_v55  ;;  %v252_v25 = vand.u32 4294901760, %v251_v8 }
  0x28   :  { %872 = vmatprep.subr.mxu1 %v1088_v1  ;;  %888 = vmatprep.mubr.msk.f32.mxu1 %vm1089_vm3, %v1088_v1  ;;  %v259_v32 = vand.u32 4294901760, %v258_v21 }
  0x29   :  { %873 = vmatpush3.msra.mxu1 %v210_v39  ;;  %845 = vmatprep.subr.mxu0 %v1088_v1  ;;  %v1311_v39 = vand.u32 127, %v34_v34 }
  0x2a   :  { %874 = vmatprep.subr.mxu1 %v1088_v1  ;;  %846 = vmatpush3.msra.mxu0 %v1209_v60 }
  0x2b   :  { %875 = vmatpush3.msra.mxu1 %v217_v44  ;;  %847 = vmatprep.subr.mxu0 %v1088_v1 }
  0x2c   :  { %876 = vmatprep.subr.mxu1 %v1088_v1  ;;  %848 = vmatpush3.msra.mxu0 %v1229_v12 }
  0x2d   :  { %877 = vmatpush3.msra.mxu1 %v224_v52  ;;  %849 = vmatprep.subr.mxu0 %v1088_v1 }
  0x2e   :  { %878 = vmatprep.subr.mxu1 %v1088_v1  ;;  %850 = vmatpush3.msra.mxu0 %v1241_v30 }
  0x2f   :  { %879 = vmatpush3.msra.mxu1 %v231_v62  ;;  %851 = vmatprep.subr.mxu0 %v1088_v1 }
  0x30   :  { %880 = vmatprep.subr.mxu1 %v1088_v1  ;;  %852 = vmatpush3.msra.mxu0 %v1253_v37 }
  0x31   :  { %881 = vmatpush3.msra.mxu1 %v238_v5  ;;  %853 = vmatprep.mubr.msk.f32.mxu0 %vm1089_vm3, %v1088_v1 }
  0x32   :  { %882 = vmatprep.subr.mxu1 %v1088_v1  ;;  %891 = vmatprep.subr.mxu0 %v1088_v1 }
  0x33   :  { %883 = vmatpush3.msra.mxu1 %v245_v14 }
  0x34   :  { %884 = vmatprep.subr.mxu1 %v1088_v1 }
  0x35   :  { %885 = vmatpush3.msra.mxu1 %v252_v25 }
  0x36   :  { %886 = vmatprep.subr.mxu1 %v1088_v1 }
  0x37   :  { %887 = vmatpush3.msra.mxu1 %v259_v32 }
  0x38   :  { %926 = vmatprep.subr.mxu1 %v1088_v1 }
  0x91   :  { %v1313_v40 = vpop.permute.xlu0 %37 }
  0x92   :  { %vm39_vm4 = vcmp.eq.s32.totalorder %v1311_v39, %v1313_v40 }
  0x93   :  { %v715_v44 = vsel %vm39_vm4, 1.0, %v1088_v1  ;;  %889 = vmatmul.mubr.msk.f32.vlgmr.msra.gmra.mxu1 %vm39_vm4, %v1090_v45 }
  0x94   :  { %v1325_v52 = vsub.f32 %v715_v44, %v715_v44  ;;  %927 = vmatpush3.msra.mxu1 %v1115_v6  ;;  %958 = vmatprep.mubr.msk.f32.mxu1 %vm1089_vm3, %v1088_v1 }
  0x95   :  { %928 = vmatprep.subr.mxu1 %v1088_v1 }
  0x96   :  { %929 = vmatpush3.msra.mxu1 %v1117_v7  ;;  %v141_v56 = vand.u32 4294901760, %v1325_v52 }
  0x97   :  { %930 = vmatprep.subr.mxu1 %v1088_v1 }
  0x98   :  { %931 = vmatpush3.msra.mxu1 %v1119_v10  ;;  %v142_v62 = vsub.f32 %v1325_v52, %v141_v56 }
  0x99   :  { %932 = vmatprep.subr.mxu1 %v1088_v1 }
  0x9a   :  { %933 = vmatpush3.msra.mxu1 %v1121_v11  ;;  %v143_v63 = vand.u32 4294901760, %v142_v62 }
  0x9b   :  { %934 = vmatprep.subr.mxu1 %v1088_v1 }
  0x9c   :  { %935 = vmatpush3.msra.mxu1 %v1129_v17  ;;  %854 = vmatmul.mubr.f32.vlgmr.msra.gmra.mxu0 %v143_v63 }
  0x9d   :  { %892 = vmatpush3.msra.mxu0 %v1124_v15  ;;  %936 = vmatprep.subr.mxu1 %v1088_v1 }
  0x9e   :  { %893 = vmatprep.subr.mxu0 %v1088_v1  ;;  %937 = vmatpush3.msra.mxu1 %v1139_v20 }
  0x9f   :  { %894 = vmatpush3.msra.mxu0 %v1127_v16  ;;  %938 = vmatprep.subr.mxu1 %v1088_v1 }
  0xa0   :  { %895 = vmatprep.subr.mxu0 %v1088_v1  ;;  %939 = vmatpush3.msra.mxu1 %v1167_v36 }
  0xa1   :  { %896 = vmatpush3.msra.mxu0 %v1133_v18  ;;  %940 = vmatprep.subr.mxu1 %v1088_v1 }
  0xa2   :  { %897 = vmatprep.subr.mxu0 %v1088_v1  ;;  %941 = vmatpush3.msra.mxu1 %v1171_v42 }
  0xa3   :  { %898 = vmatpush3.msra.mxu0 %v1136_v19  ;;  %942 = vmatprep.subr.mxu1 %v1088_v1 }
  0xa4   :  { %899 = vmatprep.subr.mxu0 %v1088_v1  ;;  %943 = vmatpush3.msra.mxu1 %v1184_v49 }
  0xa5   :  { %900 = vmatpush3.msra.mxu0 %v1144_v24  ;;  %944 = vmatprep.subr.mxu1 %v1088_v1 }
  0xa6   :  { %901 = vmatprep.subr.mxu0 %v1088_v1  ;;  %945 = vmatpush3.msra.mxu1 %v1187_v50 }
  0xa7   :  { %902 = vmatpush3.msra.mxu0 %v1150_v28  ;;  %946 = vmatprep.subr.mxu1 %v1088_v1 }
  0xa8   :  { %903 = vmatprep.subr.mxu0 %v1088_v1  ;;  %947 = vmatpush3.msra.mxu1 %v1192_v54 }
  0xa9   :  { %904 = vmatpush3.msra.mxu0 %v1178_v46  ;;  %948 = vmatprep.subr.mxu1 %v1088_v1 }
  0xaa   :  { %905 = vmatprep.subr.mxu0 %v1088_v1  ;;  %949 = vmatpush3.msra.mxu1 %v1194_v55 }
  0xab   :  { %906 = vmatpush3.msra.mxu0 %v1182_v48  ;;  %950 = vmatprep.subr.mxu1 %v1088_v1 }
  0xac   :  { %907 = vmatprep.subr.mxu0 %v1088_v1  ;;  %951 = vmatpush3.msra.mxu1 %v1209_v60 }
  0xad   :  { %908 = vmatpush3.msra.mxu0 %v1201_v58  ;;  %952 = vmatprep.subr.mxu1 %v1088_v1 }
  0xae   :  { %909 = vmatprep.subr.mxu0 %v1088_v1  ;;  %953 = vmatpush3.msra.mxu1 %v1229_v12 }
  0xaf   :  { %910 = vmatpush3.msra.mxu0 %v1204_v59  ;;  %954 = vmatprep.subr.mxu1 %v1088_v1 }
  0xb0   :  { %911 = vmatprep.subr.mxu0 %v1088_v1  ;;  %955 = vmatpush3.msra.mxu1 %v1241_v30 }
  0xb1   :  { %912 = vmatpush3.msra.mxu0 %v1216_v2  ;;  %956 = vmatprep.subr.mxu1 %v1088_v1 }
  0xb2   :  { %913 = vmatprep.subr.mxu0 %v1088_v1  ;;  %957 = vmatpush3.msra.mxu1 %v1253_v37 }
  0xb3   :  { %914 = vmatpush3.msra.mxu0 %v1222_v3  ;;  %959 = vmatmul.mubr.f32.vlgmr.msra.gmra.mxu1 %v141_v56 }
  0xb4   :  { %996 = vmatprep.subr.mxu1 %v1088_v1  ;;  %915 = vmatprep.subr.mxu0 %v1088_v1 }
  0xb5   :  { %997 = vmatpush3.msra.mxu1 %v1115_v6  ;;  %916 = vmatpush3.msra.mxu0 %v1234_v13 }
  0xb6   :  { %998 = vmatprep.subr.mxu1 %v1088_v1  ;;  %917 = vmatprep.subr.mxu0 %v1088_v1 }
  0xb7   :  { %999 = vmatpush3.msra.mxu1 %v1117_v7  ;;  %918 = vmatpush3.msra.mxu0 %v1250_v35 }
  0xb8   :  { %1000 = vmatprep.subr.mxu1 %v1088_v1  ;;  %919 = vmatprep.subr.mxu0 %v1088_v1 }
  0xb9   :  { %1001 = vmatpush3.msra.mxu1 %v1119_v10  ;;  %920 = vmatpush3.msra.mxu0 %v1262_v43 }
  0xba   :  { %1002 = vmatprep.subr.mxu1 %v1088_v1  ;;  %921 = vmatprep.subr.mxu0 %v1088_v1 }
  0xbb   :  { %1003 = vmatpush3.msra.mxu1 %v1121_v11  ;;  %922 = vmatpush3.msra.mxu0 %v1272_v51 }
  0xbc   :  { %923 = vmatprep.mubr.msk.f32.mxu0 %vm1089_vm3, %v1088_v1  ;;  %1004 = vmatprep.subr.mxu1 %v1088_v1 }
  0xbd   :  { %924 = vmatmul.mubr.f32.vlgmr.msra.gmra.mxu0 %v1325_v52  ;;  %961 = vmatprep.subr.mxu0 %v1088_v1 }
  0xbe   :  { %1005 = vmatpush3.msra.mxu1 %v1129_v17  ;;  %962 = vmatpush3.msra.mxu0 %v152_v22 }
  0xbf   :  { %1006 = vmatprep.subr.mxu1 %v1088_v1  ;;  %963 = vmatprep.subr.mxu0 %v1088_v1 }
  0xc0   :  { %1007 = vmatpush3.msra.mxu1 %v1139_v20  ;;  %964 = vmatpush3.msra.mxu0 %v159_v23 }
  0xc1   :  { %1008 = vmatprep.subr.mxu1 %v1088_v1  ;;  %965 = vmatprep.subr.mxu0 %v1088_v1 }
  0xc2   :  { %1009 = vmatpush3.msra.mxu1 %v1167_v36  ;;  %966 = vmatpush3.msra.mxu0 %v166_v26 }
  0xc3   :  { %1010 = vmatprep.subr.mxu1 %v1088_v1  ;;  %967 = vmatprep.subr.mxu0 %v1088_v1 }
  0xc4   :  { %1011 = vmatpush3.msra.mxu1 %v1171_v42  ;;  %968 = vmatpush3.msra.mxu0 %v173_v27 }
  0xc5   :  { %1012 = vmatprep.subr.mxu1 %v1088_v1  ;;  %969 = vmatprep.subr.mxu0 %v1088_v1 }
  0xc6   :  { %1013 = vmatpush3.msra.mxu1 %v1184_v49  ;;  %970 = vmatpush3.msra.mxu0 %v180_v33 }
  0xc7   :  { %1014 = vmatprep.subr.mxu1 %v1088_v1  ;;  %971 = vmatprep.subr.mxu0 %v1088_v1 }
  0xc8   :  { %1015 = vmatpush3.msra.mxu1 %v1187_v50  ;;  %972 = vmatpush3.msra.mxu0 %v187_v41 }
  0xc9   :  { %1016 = vmatprep.subr.mxu1 %v1088_v1  ;;  %973 = vmatprep.subr.mxu0 %v1088_v1 }
  0xca   :  { %1017 = vmatpush3.msra.mxu1 %v1192_v54  ;;  %974 = vmatpush3.msra.mxu0 %v194_v53 }
  0xcb   :  { %1018 = vmatprep.subr.mxu1 %v1088_v1  ;;  %975 = vmatprep.subr.mxu0 %v1088_v1 }
  0xcc   :  { %1019 = vmatpush3.msra.mxu1 %v1194_v55  ;;  %976 = vmatpush3.msra.mxu0 %v201_v57 }
  0xcd   :  { %1020 = vmatprep.subr.mxu1 %v1088_v1  ;;  %977 = vmatprep.subr.mxu0 %v1088_v1 }
  0xce   :  { %1021 = vmatpush3.msra.mxu1 %v1209_v60  ;;  %978 = vmatpush3.msra.mxu0 %v208_v0 }
  0xcf   :  { %1022 = vmatprep.subr.mxu1 %v1088_v1  ;;  %979 = vmatprep.subr.mxu0 %v1088_v1 }
  0xd0   :  { %1023 = vmatpush3.msra.mxu1 %v1229_v12  ;;  %980 = vmatpush3.msra.mxu0 %v215_v9 }
  0xd1   :  { %1024 = vmatprep.subr.mxu1 %v1088_v1  ;;  %981 = vmatprep.subr.mxu0 %v1088_v1 }
  0xd2   :  { %1025 = vmatpush3.msra.mxu1 %v1241_v30  ;;  %982 = vmatpush3.msra.mxu0 %v222_v29 }
  0xd3   :  { %1026 = vmatprep.subr.mxu1 %v1088_v1  ;;  %983 = vmatprep.subr.mxu0 %v1088_v1 }
  0xd4   :  { %1027 = vmatpush3.msra.mxu1 %v1253_v37  ;;  %1028 = vmatprep.mubr.msk.f32.mxu1 %vm1089_vm3, %v1088_v1 }
  0xd5   :  { %984 = vmatpush3.msra.mxu0 %v229_v31  ;;  %1029 = vmatmul.mubr.msk.f32.vlgmr.msra.gmra.mxu1 %vm39_vm4, %v1090_v45 }
  0xd6   :  { %985 = vmatprep.subr.mxu0 %v1088_v1  ;;  %993 = vmatprep.mubr.msk.f32.mxu0 %vm1089_vm3, %v1088_v1 }
  0xd7   :  { %986 = vmatpush3.msra.mxu0 %v236_v38 }
  0xd8   :  { %987 = vmatprep.subr.mxu0 %v1088_v1 }
  0xd9   :  { %988 = vmatpush3.msra.mxu0 %v243_v47 }
  0xda   :  { %989 = vmatprep.subr.mxu0 %v1088_v1 }
  0xdb   :  { %990 = vmatpush3.msra.mxu0 %v250_v61 }
  0xdc   :  { %991 = vmatprep.subr.mxu0 %v1088_v1 }
  0xdd   :  { %992 = vmatpush3.msra.mxu0 %v257_v4 }
  0xde   :  { %994 = vmatmul.mubr.msk.f32.vlgmr.msra.gmra.mxu0 %vm39_vm4, %v1090_v45 }
 0x153   :  { %v296_v6 = vpop.f32.mrf.mxu1 }
 0x155   :  { %v890_v7 = vpop.f32.mrf.mxu1 }
 0x15c   :  { %v145_v10 = vpop.f32.mrf.mxu0 }
 0x15d   :  { %v297_v20 = vadd.f32 %v296_v6, %v145_v10 }
 0x15e   :  { %v855_v11 = vpop.f32.mrf.mxu0 }
 0x173   :  { %v489_v15 = vpop.f32.mrf.mxu1 }
 0x175   :  { %v960_v16 = vpop.f32.mrf.mxu1 }
 0x17d   :  { %v400_v17 = vpop.f32.mrf.mxu0 }
 0x17e   :  { %v401_v1 = vadd.f32 %v400_v17, %v297_v20 }
 0x17f   :  { %v925_v18 = vpop.f32.mrf.mxu0 }
 0x180   :  { %v490_v23 = vadd.f32 %v489_v15, %v401_v1 }
 0x195   :  { %v695_v19 = vpop.f32.mrf.mxu1 }
 0x197   :  { %v1030_v22 = vpop.f32.mrf.mxu1 }
 0x19e   :  { %v608_v24 = vpop.f32.mrf.mxu0 }
 0x19f   :  { %v609_v26 = vadd.f32 %v608_v24, %v490_v23 }
 0x1a0   :  { %v995_v27 = vpop.f32.mrf.mxu0 }
 0x1a1   :  { %v696_v28 = vadd.f32 %v695_v19, %v609_v26 }
 0x1a3   :  { %699 = vst [vmem:[#allocation5] sm:$0xff] %v696_v28 }
 0x1a4   :  { %1071 = shalt.err (!%p1068_p9)
}
 0x1a5   :  { %709 = dma.vmem_to_hbm [thread:$0]  %s707_s1, 128, %s1493_s2, [#allocation4]  }
 0x1a6   :  { %1082 = dma.done.wait [#allocation4], 128  }
 0x1a7   :  { %1083 = vsyncadd [#allocation4], 4294967168 }
 0x1a8   :  { %713 = vsyncpa [#allocation3], 1 }
 0x1a9   :  { %714 = vsyncpa [#allocation4], 1 }

</bundles_post_ra>
